<compile_context>
chip_gen: v7x
topology: tpu7x:2x2x1
jax: 0.10.0
libtpu: 0.0.40
codegen_flags: <defaults>
</compile_context>

<pallas_src>
import jax
import jax.numpy as jnp
from jax.experimental import pallas as pl
from jax.experimental.pallas import tpu as pltpu


# ---------------------------------------------------------------------------
# Kernel: fused Linear (MXU, f32 acc) + numerically stable log_softmax epilogue
# ---------------------------------------------------------------------------
def _classifier_log_softmax_kernel(x_ref, w_ref, b_ref, o_ref):
    # logits = x @ W + b   (f32 operands, f32 accumulation on the MXU)
    logits = jnp.dot(x_ref[...], w_ref[...], preferred_element_type=jnp.float32)
    logits = logits + b_ref[...]                      # (1, N) broadcast over rows
    # stable log_softmax over the real class dim (N, no padding)
    m = jnp.max(logits, axis=-1, keepdims=True)
    s = logits - m
    lse = jnp.log(jnp.sum(jnp.exp(s), axis=-1, keepdims=True))
    o_ref[...] = (s - lse).astype(o_ref.dtype)


# ---------------------------------------------------------------------------
# Wrapper
# ---------------------------------------------------------------------------
def downstream_head_forward(x, w, b, *, tm=4096):
    """log_softmax(x @ w + b, axis=-1).

    x: (B, S, K) or (B, K) float32 backbone features (K = 128)
    w: (K, num_classes) float32  (transpose of PyTorch nn.Linear.weight)
    b: (num_classes,)   float32
    returns: (B, S, num_classes) float32 log-probs
    """
    if x.ndim == 2:                       # mirrors `x.unsqueeze(1)` in the module
        x = x[:, None, :]
    B, S, K = x.shape
    N = w.shape[1]
    M = B * S

    # --- row tiling ---------------------------------------------------------
    # tm multiple of 8 (sublane), capped at 8192 so v5e's 16 MiB scoped-VMEM default holds.
    tm = max(8, min(int(tm), 8192) // 8 * 8)
    # Block second-to-last dim must be a multiple of 8 OR equal the full array dim.
    tm_eff = M if M <= tm else tm
    grid = (pl.cdiv(M, tm_eff),)          # ragged last block handled by Pallas masking

    x2 = x.reshape(M, K)                  # no pad, no dtype-cast pass in the wrapper
    b2 = b.reshape(1, N)

    cost = pl.CostEstimate(
        flops=2 * M * K * N,
        transcendentals=M * N + M,                    # exp per logit + log per row
        bytes_accessed=(M * K * 4 + K * N * 4 + N * 4 + M * N * 4),
    )

    out = pl.pallas_call(
        _classifier_log_softmax_kernel,
        out_shape=jax.ShapeDtypeStruct((M, N), jnp.float32),
        grid_spec=pltpu.PrefetchScalarGridSpec(
            num_scalar_prefetch=0,
            grid=grid,
            in_specs=[
                pl.BlockSpec((tm_eff, K), lambda i: (i, 0)),   # activations: streamed rows
                pl.BlockSpec((K, N), lambda i: (0, 0)),        # weight: tiny resident block
                pl.BlockSpec((1, N), lambda i: (0, 0)),        # bias: tiny resident block
            ],
            out_specs=pl.BlockSpec((tm_eff, N), lambda i: (i, 0)),  # direct (tm, N) store
        ),
        compiler_params=pltpu.CompilerParams(
            dimension_semantics=("parallel",),        # shards rows over v7x's 2 TCs
        ),
        cost_estimate=cost,
    )(x2, w, b2)

    return out.reshape(B, S, N)


# ---------------------------------------------------------------------------
# Demo / correctness check
# ---------------------------------------------------------------------------
if __name__ == "__main__":
    key = jax.random.PRNGKey(0)
    kx, kw, kb = jax.random.split(key, 3)

    batch, seq_len, feature_dim, num_classes = 2, 8, 128, 32

    # Features as produced by the frozen wav2vec2 backbone.
    x = jax.random.normal(kx, (batch, seq_len, feature_dim), jnp.float32)

    # nn.Linear(128, num_classes) parameters, stored transposed as (in, out).
    bound = 1.0 / jnp.sqrt(feature_dim)
    w = jax.random.uniform(kw, (feature_dim, num_classes), jnp.float32, -bound, bound)
    b = jax.random.uniform(kb, (num_classes,), jnp.float32, -bound, bound)

    y = downstream_head_forward(x, w, b)
    y = jax.block_until_ready(y)
    assert y.shape == (batch, seq_len, num_classes)

    # Reference: full-f32 module semantics (MXU internal rounding is the only difference).
    r32 = jax.nn.log_softmax(x @ w + b, axis=-1)
    assert jnp.allclose(y, r32, atol=5e-2, rtol=5e-2), "mismatch vs f32 reference"

    # 2-D input path (the module's `unsqueeze(1)` branch).
    x2d = x[:, 0, :]
    y2d = jax.block_until_ready(downstream_head_forward(x2d, w, b))
    assert y2d.shape == (batch, 1, num_classes)
    r2d = jax.nn.log_softmax(x2d[:, None, :] @ w + b, axis=-1)
    assert jnp.allclose(y2d, r2d, atol=5e-2, rtol=5e-2)

    print("KERNEL_OK")
</pallas_src>

<mosaic_0001>
module attributes {stable_mosaic.version = 11 : i64} {
  func.func @_classifier_log_softmax_kernel(%arg0: i32, %arg1: memref<16x128xf32, #tpu.memory_space<vmem>>, %arg2: memref<128x32xf32, #tpu.memory_space<vmem>>, %arg3: memref<1x32xf32, #tpu.memory_space<vmem>>, %arg4: memref<16x32xf32, #tpu.memory_space<vmem>>) attributes {dimension_semantics = [#tpu.dimension_semantics<parallel>], iteration_bounds = array<i64: 1>, scalar_prefetch = 0 : i64, scratch_operands = 0 : i64, tpu.core_type = #tpu.core_type<tc>, window_params = [{transform_indices = @transform_0, window_bounds = array<i64: 16, 128>}, {pipeline_mode = #tpu.pipeline_mode<synchronous>, transform_indices = @transform_1, window_bounds = array<i64: 128, 32>}, {pipeline_mode = #tpu.pipeline_mode<synchronous>, transform_indices = @transform_2, window_bounds = array<i64: 1, 32>}, {transform_indices = @transform_3, window_bounds = array<i64: 16, 32>}]} {
    %c0 = arith.constant 0 : index
    %c0_0 = arith.constant 0 : index
    %0 = vector.load %arg1[%c0, %c0_0] : memref<16x128xf32, #tpu.memory_space<vmem>>, vector<16x128xf32>
    %c0_1 = arith.constant 0 : index
    %c0_2 = arith.constant 0 : index
    %1 = vector.load %arg2[%c0_1, %c0_2] : memref<128x32xf32, #tpu.memory_space<vmem>>, vector<128x32xf32>
    %cst = arith.constant dense<0.000000e+00> : vector<16x32xf32>
    %2 = tpu.matmul %0, %1, %cst {dimension_numbers = #tpu.dot_dimension_numbers<[1], [0], [0], [1], [0, 0, 1, 1], [], []>} : vector<16x128xf32>, vector<128x32xf32>, vector<16x32xf32> -> vector<16x32xf32>
    %c0_3 = arith.constant 0 : index
    %c0_4 = arith.constant 0 : index
    %3 = vector.load %arg3[%c0_3, %c0_4] : memref<1x32xf32, #tpu.memory_space<vmem>>, vector<1x32xf32>
    %4 = vector.broadcast %3 : vector<1x32xf32> to vector<16x32xf32>
    %5 = arith.addf %2, %4 : vector<16x32xf32>
    %cst_5 = arith.constant dense<0xFF800000> : vector<16xf32>
    %6 = vector.multi_reduction <maximumf>, %5, %cst_5 [1] : vector<16x32xf32> to vector<16xf32>
    %7 = vector.shape_cast %6 : vector<16xf32> to vector<16x1xf32>
    %8 = vector.broadcast %7 : vector<16x1xf32> to vector<16x32xf32>
    %9 = arith.subf %5, %8 : vector<16x32xf32>
    %10 = math.exp %9 : vector<16x32xf32>
    %cst_6 = arith.constant dense<0.000000e+00> : vector<16xf32>
    %11 = vector.multi_reduction <add>, %10, %cst_6 [1] : vector<16x32xf32> to vector<16xf32>
    %12 = vector.shape_cast %11 : vector<16xf32> to vector<16x1xf32>
    %13 = math.log %12 : vector<16x1xf32>
    %14 = vector.broadcast %13 : vector<16x1xf32> to vector<16x32xf32>
    %15 = arith.subf %9, %14 : vector<16x32xf32>
    %c0_7 = arith.constant 0 : index
    %c0_8 = arith.constant 0 : index
    %16 = vector.load %arg4[%c0_7, %c0_8] : memref<16x32xf32, #tpu.memory_space<vmem>>, vector<16x32xf32>
    tpu.vector_store %arg4[%c0_7, %c0_8], %15 {strides = array<i32>} : memref<16x32xf32, #tpu.memory_space<vmem>>, vector<16x32xf32>,
    return
  }
  func.func @transform_0(%arg0: i32) -> (i32, i32) {
    %c0_i32 = arith.constant 0 : i32
    %c0_i32_0 = arith.constant 0 : i32
    return %arg0, %c0_i32 : i32, i32
  }
  func.func @transform_1(%arg0: i32) -> (i32, i32) {
    %c0_i32 = arith.constant 0 : i32
    %c0_i32_0 = arith.constant 0 : i32
    %c0_i32_1 = arith.constant 0 : i32
    return %c0_i32, %c0_i32_0 : i32, i32
  }
  func.func @transform_2(%arg0: i32) -> (i32, i32) {
    %c0_i32 = arith.constant 0 : i32
    %c0_i32_0 = arith.constant 0 : i32
    %c0_i32_1 = arith.constant 0 : i32
    return %c0_i32, %c0_i32_0 : i32, i32
  }
  func.func @transform_3(%arg0: i32) -> (i32, i32) {
    %c0_i32 = arith.constant 0 : i32
    %c0_i32_0 = arith.constant 0 : i32
    return %arg0, %c0_i32 : i32, i32
  }
}

</mosaic_0001>

<bundles_post_ra>
// kernel: tpu_custom_call.1
= control target key start
LH: loop header
LB: loop body
LE: loop exit
PB: predicated region body
PF: predicated region fallthrough
CT: control target
= control target key end

     0   :  { %s377_s0 = inlined_call_operand.vmem [shape: f32[16,128], index: 0, kind: input, shape index: {}]   ;;  %s378_s1 = inlined_call_operand.vmem [shape: f32[128,32], index: 1, kind: input, shape index: {}]   ;;  %s379_s2 = inlined_call_operand.vmem [shape: f32[1,32], index: 2, kind: input, shape index: {}]   ;;  %s380_s3 = inlined_call_operand.hbm [shape: f32[16,32], index: 3, kind: output, shape index: {}]  }
   0x1   :  { %v17_v0 = vld [vmem:[%s378_s1] sm:$0xff]  ;;  %v18_v1 = vld [vmem:[%s378_s1 + $0x8] sm:$0xff]  ;;  %v19_v2 = vld [vmem:[%s378_s1 + $0x10] sm:$0xff] }
   0x2   :  { %v212_v3 = vpack.c.bf16 %v18_v1, %v17_v0  ;;  %v20_v4 = vld [vmem:[%s378_s1 + $0x18] sm:$0xff]  ;;  %v21_v6 = vld [vmem:[%s378_s1 + $0x20] sm:$0xff]  ;;  %v22_v7 = vld [vmem:[%s378_s1 + $0x28] sm:$0xff] }
   0x3   :  { %v216_v5 = vpack.c.bf16 %v20_v4, %v19_v2  ;;  %v220_v8 = vpack.c.bf16 %v22_v7, %v21_v6  ;;  %v15_v9 = vld [vmem:[%s377_s0] sm:$0xff]  ;;  %v23_v10 = vld [vmem:[%s378_s1 + $0x30] sm:$0xff]  ;;  %v24_v11 = vld [vmem:[%s378_s1 + $0x38] sm:$0xff] }
   0x4   :  { %213 = vmatprep.subr.bf16.mxu0 %v212_v3  ;;  %209 = vmatprep.mubr.f32.mxu0 %v15_v9 }
   0x5   :  { %215 = vmatpush3.bf16.msra.mxu0 %v212_v3 }
   0x6   :  { %217 = vmatprep.subr.bf16.mxu0 %v216_v5 }
   0x7   :  { %8 = vsyncpa [#allocation3], 0  ;;  %v224_v12 = vpack.c.bf16 %v24_v11, %v23_v10  ;;  %v25_v13 = vld [vmem:[%s378_s1 + $0x40] sm:$0xff]  ;;  %v26_v14 = vld [vmem:[%s378_s1 + $0x48] sm:$0xff]  ;;  %vm115_vm0 = vcmask 261120  }
   0x8   :  { %v228_v15 = vpack.c.bf16 %v26_v14, %v25_v13  ;;  %v27_v16 = vld [vmem:[%s378_s1 + $0x50] sm:$0xff]  ;;  %v28_v17 = vld [vmem:[%s378_s1 + $0x58] sm:$0xff]  ;;  %v29_v19 = vld [vmem:[%s378_s1 + $0x60] sm:$0xff] }
   0x9   :  { %219 = vmatpush3.bf16.msra.mxu0 %v216_v5  ;;  %v232_v18 = vpack.c.bf16 %v28_v17, %v27_v16  ;;  %v30_v20 = vld [vmem:[%s378_s1 + $0x68] sm:$0xff]  ;;  %v31_v22 = vld [vmem:[%s378_s1 + $0x70] sm:$0xff]  ;;  %v32_v23 = vld [vmem:[%s378_s1 + $0x78] sm:$0xff] }
   0xa   :  { %221 = vmatprep.subr.bf16.mxu0 %v220_v8  ;;  %v236_v21 = vpack.c.bf16 %v30_v20, %v29_v19  ;;  %v240_v24 = vpack.c.bf16 %v32_v23, %v31_v22  ;;  %v16_v25 = vld [vmem:[%s377_s0 + $0x8] sm:$0xff]  ;;  %v158_v26 = vld [vmem:[%s379_s2] ss:$0 sm:$0xff]  ;;  %s279_s0 = smov [#allocation2]  }
   0xb   :  { %s147_s1 = sshll.u32 %s279_s0, 4  ;;  %s148_s1 = int_to_ptr.vmem [resolvable:$true] %s147_s1 }
   0xc   :  { %s255_s2 = scalar_lea.vmem %s148_s1, 256  ;;  %p260_p1 = scmp.lt.s32.totalorder %s148_s1, %s148_s1 }
   0xd   :  { %223 = vmatpush3.bf16.msra.mxu0 %v220_v8  ;;  %p256_p0 = scmp.ne.s32.totalorder %s148_s1, %s255_s2  ;;  %p261_p2 = scmp.lt.s32.totalorder %s255_s2, %s255_s2 }
   0xe   :  { %225 = vmatprep.subr.bf16.mxu0 %v224_v12 }
   0xf   :  { %p262_p3 = por %p261_p2, %p260_p1 }
  0x11   :  { %227 = vmatpush3.bf16.msra.mxu0 %v224_v12  ;;  %p263_p4 = pnand %p262_p3, %p256_p0 }
  0x12   :  { %229 = vmatprep.subr.bf16.mxu0 %v228_v15 }
  0x15   :  { %231 = vmatpush3.bf16.msra.mxu0 %v228_v15 }
  0x16   :  { %233 = vmatprep.subr.bf16.mxu0 %v232_v18 }
  0x19   :  { %235 = vmatpush3.bf16.msra.mxu0 %v232_v18 }
  0x1a   :  { %237 = vmatprep.subr.bf16.mxu0 %v236_v21 }
  0x1d   :  { %239 = vmatpush3.bf16.msra.mxu0 %v236_v21 }
  0x1e   :  { %241 = vmatprep.subr.bf16.mxu0 %v240_v24 }
  0x21   :  { %243 = vmatpush3.bf16.msra.mxu0 %v240_v24 }
  0x24   :  { %210 = vmatmul.mubr.f32.vlgmr.msra.gmra.mrb[0].mxu0 %v16_v25 }
  0xf7   :  { %v211_v27 = vpop.f32.mrb[0].mxu0 }
  0xf8   :  { %v106_v28 = vpop.f32.mrb[1].mxu0  ;;  %v112_v30 = vadd.f32 %v211_v27, %v158_v26 }
  0xf9   :  { %v107_v29 = vadd.f32 %v158_v26, %v106_v28 }
  0xfa   :  { %v119_v32 = vsel %vm115_vm0, %v112_v30, -inf }
  0xfb   :  { %v116_v31 = vsel %vm115_vm0, %v107_v29, -inf }
  0xfc   :  { %117 = vmax.xlane.f32.xlu0 %v116_v31 }
 0x100   :  { %120 = vmax.xlane.f32.xlu0 %v119_v32 }
 0x189   :  { %v118_v33 = vpop.xlane.xlu0 %117 }
 0x18a   :  { %v122_v34 = vsub.f32 %v107_v29, %v118_v33 }
 0x18c   :  { %v124_v35 = vmul.f32 1.442695, %v122_v34 }
 0x18d   :  { %v121_v36 = vpop.xlane.xlu0 %120 }
 0x18e   :  { %247 = vpow2.f32 %v124_v35  ;;  %v123_v37 = vsub.f32 %v112_v30, %v121_v36 }
 0x190   :  { %v126_v38 = vmul.f32 1.442695, %v123_v37 }
 0x192   :  { %249 = vpow2.f32 %v126_v38 }
 0x198   :  { %v248_v39 = vpop.eup %247 }
 0x199   :  { %v128_v40 = vsel %vm115_vm0, %v248_v39, 0.0 }
 0x19a   :  { %129 = vadd.xlane.f32.xlu1 %v128_v40 }
 0x19c   :  { %v250_v41 = vpop.eup %249 }
 0x19d   :  { %v131_v42 = vsel %vm115_vm0, %v250_v41, 0.0 }
 0x19e   :  { %132 = vadd.xlane.f32.xlu1 %v131_v42 }
 0x227   :  { %v130_v43 = vpop.xlane.xlu1 %129 }
 0x228   :  { %251 = vlog2.f32 %v130_v43 }
 0x22b   :  { %v133_v44 = vpop.xlane.xlu1 %132 }
 0x22c   :  { %253 = vlog2.f32 %v133_v44 }
 0x232   :  { %v252_v45 = vpop.eup %251 }
 0x233   :  { %v135_v46 = vmul.f32 0.6931472, %v252_v45 }
 0x235   :  { %v138_v47 = vsub.f32 %v122_v34, %v135_v46 }
 0x236   :  { %v254_v48 = vpop.eup %253 }
 0x237   :  { %140 = vst.msk [vmem:[#allocation2] sm:$0xff] %vm115_vm0, %v138_v47  ;;  %v137_v49 = vmul.f32 0.6931472, %v254_v48 }
 0x239   :  { %v139_v50 = vsub.f32 %v123_v37, %v137_v49 }
 0x23b   :  { %141 = vst.msk [vmem:[#allocation2 + $0x8] sm:$0xff] %vm115_vm0, %v139_v50 }
 0x23c   :  { %266 = shalt.err (!%p263_p4)
}
 0x23d   :  { %s267_s25 = scalar_lea.hbm %s380_s3, 256 }
 0x23e   :  { %p268_p5 = scmp.ne.s32.totalorder %s380_s3, %s267_s25  ;;  %p271_p6 = scmp.lt.u32.totalorder %s267_s25, %s380_s3 }
 0x240   :  { %p273_p7 = pnand %p271_p6, %p268_p5 }
 0x242   :  { %276 = shalt.err (!%p273_p7)
}
 0x243   :  { %s280_s30 = smov 128   ;;  %s281_s4 = smov 8  }
 0x244   :  { %153 = dma.vmem_to_hbm [thread:$0]  %s148_s1, 256, %s380_s3, [#allocation3], %s280_s30, %s280_s30, %s281_s4  }
 0x245   :  { %277 = dma.done.wait [#allocation3], 256  }
 0x246   :  { %278 = vsyncadd [#allocation3], 4294967040 }
 0x247   :  { %157 = vsyncpa [#allocation3], 1 }

</bundles_post_ra>
